<compile_context>
chip_gen: v6e
topology: v6e:2x2x1
jax: 0.10.0
libtpu: 0.0.40
codegen_flags: <defaults>
</compile_context>

<pallas_src>
import functools

import jax
import jax.numpy as jnp
from jax.experimental import pallas as pl
from jax.experimental.pallas import tpu as pltpu

GAMMA = 1.5
ALPHA = 0.25
LANES = 128
SUBLANES = 8
MAX_BLOCK_ROWS = 1024


def _focal_loss_kernel(pred_ref, true_ref, out_ref, *, gamma, alpha):
    x = pred_ref[...].astype(jnp.float32)
    y = true_ref[...].astype(jnp.float32)

    # Shared transcendental: e = exp(-|x|) reused by BCE and sigmoid.
    e = jnp.exp(-jnp.abs(x))

    # BCEWithLogitsLoss(reduction='none'), numerically stable form.
    bce = jnp.maximum(x, 0.0) - x * y + jnp.log1p(e)

    # sigmoid(x) from the same exp:  x>=0 -> 1/(1+e),  x<0 -> e/(1+e)
    r = 1.0 / (1.0 + e)
    p = jnp.where(x >= 0.0, r, e * r)

    p_t = y * p + (1.0 - y) * (1.0 - p)
    alpha_factor = y * alpha + (1.0 - y) * (1.0 - alpha)

    t = 1.0 - p_t
    if gamma == 1.5:
        modulating_factor = t * jnp.sqrt(t)   # t**1.5 without exp(1.5*log(t))
    else:
        modulating_factor = t ** gamma

    loss = bce * alpha_factor * modulating_factor

    # Per-block partial sum, reduced over sublanes -> lane-dense (1, 128) row.
    out_ref[...] = jnp.sum(loss, axis=0, keepdims=True)


def focal_loss(pred, true, gamma=GAMMA, alpha=ALPHA):
    """FocalLoss(BCEWithLogitsLoss(reduction='mean')) forward. Returns scalar f32."""
    assert pred.shape == true.shape
    n_total = pred.size

    # Plain-JAX glue: flatten NCHW -> lane-dense 2-D (rows, 128). No up-cast.
    assert n_total % LANES == 0, "demo assumes total elements divisible by 128"
    rows = n_total // LANES
    assert rows % SUBLANES == 0, "demo assumes rows divisible by 8"
    p2d = pred.reshape(rows, LANES)
    t2d = true.reshape(rows, LANES)

    # Biggest block that fits comfortably in VMEM on all generations.
    if rows <= MAX_BLOCK_ROWS:
        block_rows = rows
    else:
        block_rows = SUBLANES
        for cand in range(MAX_BLOCK_ROWS, SUBLANES - 1, -SUBLANES):
            if rows % cand == 0:
                block_rows = cand
                break
    num_blocks = rows // block_rows

    kernel = functools.partial(
        _focal_loss_kernel,
        gamma=float(gamma),   # plain Python floats -> immediate constants
        alpha=float(alpha),
    )

    partials = pl.pallas_call(
        kernel,
        out_shape=jax.ShapeDtypeStruct((num_blocks, LANES), jnp.float32),
        grid_spec=pltpu.PrefetchScalarGridSpec(
            num_scalar_prefetch=0,
            grid=(num_blocks,),
            in_specs=[
                pl.BlockSpec((block_rows, LANES), lambda i: (i, 0)),
                pl.BlockSpec((block_rows, LANES), lambda i: (i, 0)),
            ],
            out_specs=pl.BlockSpec((1, LANES), lambda i: (i, 0)),
        ),
        compiler_params=pltpu.CompilerParams(
            dimension_semantics=("parallel",),
        ),
    )(p2d, t2d)

    return jnp.sum(partials) * jnp.float32(1.0 / n_total)


def _focal_loss_ref(pred, true, gamma=GAMMA, alpha=ALPHA):
    x = pred.astype(jnp.float32)
    y = true.astype(jnp.float32)
    bce = jnp.maximum(x, 0.0) - x * y + jnp.log1p(jnp.exp(-jnp.abs(x)))
    p = jax.nn.sigmoid(x)
    p_t = y * p + (1.0 - y) * (1.0 - p)
    af = y * alpha + (1.0 - y) * (1.0 - alpha)
    mf = (1.0 - p_t) ** gamma
    return jnp.mean(bce * af * mf)


if __name__ == "__main__":
    key = jax.random.PRNGKey(0)
    k_pred, k_true = jax.random.split(key)

    # NCHW-style logits and binary targets (as in YOLO objectness/cls heads).
    shape = (2, 4, 16, 16)
    pred = jax.random.normal(k_pred, shape, dtype=jnp.float32) * 2.0
    true = jax.random.bernoulli(k_true, p=0.3, shape=shape).astype(jnp.float32)

    out = focal_loss(pred, true)
    out = jax.block_until_ready(out)

    ref = _focal_loss_ref(pred, true)
    assert jnp.allclose(out, ref, rtol=1e-5, atol=1e-6), (out, ref)

    print("KERNEL_OK")
</pallas_src>

<mosaic_0001>
module attributes {stable_mosaic.version = 11 : i64} {
  func.func @_focal_loss_kernel(%arg0: i32, %arg1: memref<16x128xf32, #tpu.memory_space<vmem>>, %arg2: memref<16x128xf32, #tpu.memory_space<vmem>>, %arg3: memref<1x128xf32, #tpu.memory_space<vmem>>) attributes {dimension_semantics = [#tpu.dimension_semantics<parallel>], iteration_bounds = array<i64: 1>, scalar_prefetch = 0 : i64, scratch_operands = 0 : i64, tpu.core_type = #tpu.core_type<tc>, window_params = [{transform_indices = @transform_0, window_bounds = array<i64: 16, 128>}, {transform_indices = @transform_1, window_bounds = array<i64: 16, 128>}, {transform_indices = @transform_2, window_bounds = array<i64: 1, 128>}]} {
    %c0 = arith.constant 0 : index
    %c0_0 = arith.constant 0 : index
    %0 = vector.load %arg1[%c0, %c0_0] : memref<16x128xf32, #tpu.memory_space<vmem>>, vector<16x128xf32>
    %c0_1 = arith.constant 0 : index
    %c0_2 = arith.constant 0 : index
    %1 = vector.load %arg2[%c0_1, %c0_2] : memref<16x128xf32, #tpu.memory_space<vmem>>, vector<16x128xf32>
    %2 = math.absf %0 : vector<16x128xf32>
    %cst = arith.constant 0.000000e+00 : f32
    %3 = vector.broadcast %cst : f32 to vector<16x128xf32>
    %4 = arith.subf %3, %2 : vector<16x128xf32>
    %5 = math.exp %4 : vector<16x128xf32>
    %cst_3 = arith.constant 0.000000e+00 : f32
    %6 = vector.broadcast %cst_3 : f32 to vector<16x128xf32>
    %7 = arith.maximumf %0, %6 : vector<16x128xf32>
    %8 = arith.mulf %0, %1 : vector<16x128xf32>
    %9 = arith.subf %7, %8 : vector<16x128xf32>
    %10 = math.log1p %5 : vector<16x128xf32>
    %11 = arith.addf %9, %10 : vector<16x128xf32>
    %cst_4 = arith.constant 1.000000e+00 : f32
    %12 = vector.broadcast %cst_4 : f32 to vector<16x128xf32>
    %13 = arith.addf %12, %5 : vector<16x128xf32>
    %cst_5 = arith.constant 1.000000e+00 : f32
    %14 = vector.broadcast %cst_5 : f32 to vector<16x128xf32>
    %15 = arith.divf %14, %13 : vector<16x128xf32>
    %cst_6 = arith.constant 0.000000e+00 : f32
    %16 = vector.broadcast %cst_6 : f32 to vector<16x128xf32>
    %17 = arith.cmpf oge, %0, %16 : vector<16x128xf32>
    %18 = arith.mulf %5, %15 : vector<16x128xf32>
    %19 = arith.select %17, %15, %18 : vector<16x128xi1>, vector<16x128xf32>
    %20 = arith.mulf %1, %19 : vector<16x128xf32>
    %cst_7 = arith.constant 1.000000e+00 : f32
    %21 = vector.broadcast %cst_7 : f32 to vector<16x128xf32>
    %22 = arith.subf %21, %1 : vector<16x128xf32>
    %cst_8 = arith.constant 1.000000e+00 : f32
    %23 = vector.broadcast %cst_8 : f32 to vector<16x128xf32>
    %24 = arith.subf %23, %19 : vector<16x128xf32>
    %25 = arith.mulf %22, %24 : vector<16x128xf32>
    %26 = arith.addf %20, %25 : vector<16x128xf32>
    %cst_9 = arith.constant 2.500000e-01 : f32
    %27 = vector.broadcast %cst_9 : f32 to vector<16x128xf32>
    %28 = arith.mulf %1, %27 : vector<16x128xf32>
    %cst_10 = arith.constant 1.000000e+00 : f32
    %29 = vector.broadcast %cst_10 : f32 to vector<16x128xf32>
    %30 = arith.subf %29, %1 : vector<16x128xf32>
    %cst_11 = arith.constant 7.500000e-01 : f32
    %31 = vector.broadcast %cst_11 : f32 to vector<16x128xf32>
    %32 = arith.mulf %30, %31 : vector<16x128xf32>
    %33 = arith.addf %28, %32 : vector<16x128xf32>
    %cst_12 = arith.constant 1.000000e+00 : f32
    %34 = vector.broadcast %cst_12 : f32 to vector<16x128xf32>
    %35 = arith.subf %34, %26 : vector<16x128xf32>
    %36 = math.sqrt %35 : vector<16x128xf32>
    %37 = arith.mulf %35, %36 : vector<16x128xf32>
    %38 = arith.mulf %11, %33 : vector<16x128xf32>
    %39 = arith.mulf %38, %37 : vector<16x128xf32>
    %cst_13 = arith.constant dense<0.000000e+00> : vector<128xf32>
    %40 = vector.multi_reduction <add>, %39, %cst_13 [0] : vector<16x128xf32> to vector<128xf32>
    %41 = vector.shape_cast %40 : vector<128xf32> to vector<1x128xf32>
    %c0_14 = arith.constant 0 : index
    %c0_15 = arith.constant 0 : index
    %42 = vector.load %arg3[%c0_14, %c0_15] : memref<1x128xf32, #tpu.memory_space<vmem>>, vector<1x128xf32>
    tpu.vector_store %arg3[%c0_14, %c0_15], %41 {strides = array<i32>} : memref<1x128xf32, #tpu.memory_space<vmem>>, vector<1x128xf32>,
    return
  }
  func.func @transform_0(%arg0: i32) -> (i32, i32) {
    %c0_i32 = arith.constant 0 : i32
    %c0_i32_0 = arith.constant 0 : i32
    return %arg0, %c0_i32 : i32, i32
  }
  func.func @transform_1(%arg0: i32) -> (i32, i32) {
    %c0_i32 = arith.constant 0 : i32
    %c0_i32_0 = arith.constant 0 : i32
    return %arg0, %c0_i32 : i32, i32
  }
  func.func @transform_2(%arg0: i32) -> (i32, i32) {
    %c0_i32 = arith.constant 0 : i32
    %c0_i32_0 = arith.constant 0 : i32
    return %arg0, %c0_i32 : i32, i32
  }
}

</mosaic_0001>

<bundles_post_ra>
// kernel: tpu_custom_call.1
= control target key start
LH: loop header
LB: loop body
LE: loop exit
PB: predicated region body
PF: predicated region fallthrough
CT: control target
= control target key end

     0   :  { %7 = vsyncpa [#allocation3], 0  ;;  %s274_s0 = inlined_call_operand.hbm [shape: f32[16,128], index: 0, kind: input, shape index: {}]   ;;  %s275_s1 = inlined_call_operand.hbm [shape: f32[16,128], index: 1, kind: input, shape index: {}]   ;;  %s276_s2 = inlined_call_operand.hbm [shape: f32[1,128], index: 2, kind: output, shape index: {}]  }
   0x1   :  { %8 = vsyncpa [#allocation6], 0 }
   0x2   :  { %9 = vsyncpa [#allocation4], 0  ;;  %s239_s9 = smov [#allocation2]  }
   0x3   :  { %s15_s10 = sshll.u32 %s239_s9, 4  ;;  %s16_s10 = int_to_ptr.vmem [resolvable:$true] %s15_s10 }
   0x4   :  { %s181_s11 = scalar_lea.vmem %s16_s10, 256  ;;  %p186_p1 = scmp.lt.s32.totalorder %s16_s10, %s16_s10 }
   0x5   :  { %p182_p0 = scmp.ne.s32.totalorder %s16_s10, %s181_s11  ;;  %p187_p2 = scmp.lt.s32.totalorder %s181_s11, %s181_s11 }
   0x7   :  { %p188_p3 = por %p187_p2, %p186_p1 }
   0x9   :  { %p189_p4 = pnand %p188_p3, %p182_p0 }
   0xb   :  { %192 = shalt.err (!%p189_p4)
}
   0xc   :  { %s240_s12 = smov 128   ;;  %s241_s13 = smov 8  }
   0xd   :  { %21 = dma.hbm_to_vmem [thread:$0]  %s274_s0, 256, %s16_s10, [#allocation3], %s240_s12, %s240_s12, %s241_s13  }
   0xe   :  { %s242_s16 = smov [#allocation5]  }
   0xf   :  { %s27_s17 = sshll.u32 %s242_s16, 4  ;;  %s28_s17 = int_to_ptr.vmem [resolvable:$true] %s27_s17 }
  0x10   :  { %s201_s18 = scalar_lea.vmem %s28_s17, 256  ;;  %p206_p6 = scmp.lt.s32.totalorder %s28_s17, %s28_s17 }
  0x11   :  { %p202_p5 = scmp.ne.s32.totalorder %s28_s17, %s201_s18  ;;  %p207_p7 = scmp.lt.s32.totalorder %s201_s18, %s201_s18 }
  0x13   :  { %p208_p8 = por %p207_p7, %p206_p6 }
  0x15   :  { %p209_p9 = pnand %p208_p8, %p202_p5 }
  0x17   :  { %212 = shalt.err (!%p209_p9)
}
  0x18   :  { %33 = dma.hbm_to_vmem [thread:$0]  %s275_s1, 256, %s28_s17, [#allocation6], %s240_s12, %s240_s12, %s241_s13  }
  0x19   :  { %233 = dma.done.wait [#allocation3], 256  }
  0x1a   :  { %234 = vsyncadd [#allocation3], 4294967040 }
  0x1b   :  { %235 = dma.done.wait [#allocation6], 256  }
  0x1c   :  { %236 = vsyncadd [#allocation6], 4294967040  ;;  %v40_v0 = vld [vmem:[#allocation2] sm:$0xff]  ;;  %v265_v1 = vld [vmem:[#allocation2 + $0x8] sm:$0xff]  ;;  %s243_s0 = smov [#allocation7]  }
  0x1d   :  { %v44_v2 = vand.u32 2147483647, %v40_v0  ;;  %v45_v3 = vand.u32 2147483647, %v265_v1  ;;  %v42_v12 = vld [vmem:[#allocation5] sm:$0xff]  ;;  %v43_v14 = vld [vmem:[#allocation5 + $0x8] sm:$0xff] }
  0x1e   :  { %vm84_vm0 = vcmp.ge.f32.partialorder %v40_v0, 0.0  ;;  %vm85_vm1 = vcmp.ge.f32.partialorder %v265_v1, 0.0  ;;  %v92_v18 = vsub.f32 1.0, %v42_v12  ;;  %v93_v20 = vsub.f32 1.0, %v43_v14  ;;  %s142_s1 = sshll.u32 %s243_s0, 4  ;;  %s143_s1 = int_to_ptr.vmem [resolvable:$true] %s142_s1 }
  0x1f   :  { %v46_v4 = vsub.f32 0.0, %v44_v2  ;;  %v47_v5 = vsub.f32 0.0, %v45_v3  ;;  %v52_v40 = vmax.f32 %v40_v0, 0.0  ;;  %v54_v41 = vmul.f32 %v42_v12, %v40_v0  ;;  %s213_s21 = scalar_lea.vmem %s143_s1, 16  ;;  %s217_s22 = scalar_lea.vmem %s143_s1, 32 }
  0x20   :  { %v53_v42 = vmax.f32 %v265_v1, 0.0  ;;  %v55_v43 = vmul.f32 %v43_v14, %v265_v1  ;;  %v100_v49 = vmul.f32 0.25, %v42_v12  ;;  %v102_v50 = vmul.f32 0.75, %v92_v18  ;;  %p214_p10 = scmp.ne.s32.totalorder %s143_s1, %s213_s21  ;;  %p218_p11 = scmp.lt.s32.totalorder %s143_s1, %s143_s1 }
  0x21   :  { %v48_v6 = vmul.f32 1.442695, %v46_v4  ;;  %v50_v7 = vmul.f32 1.442695, %v47_v5  ;;  %v56_v48 = vsub.f32 %v52_v40, %v54_v41  ;;  %v101_v53 = vmul.f32 0.25, %v43_v14  ;;  %p219_p12 = scmp.lt.s32.totalorder %s217_s22, %s213_s21 }
  0x22   :  { %v57_v51 = vsub.f32 %v53_v42, %v55_v43  ;;  %v103_v54 = vmul.f32 0.75, %v93_v20  ;;  %v104_v57 = vadd.f32 %v102_v50, %v100_v49 }
  0x23   :  { %157 = vpow2.f32 %v48_v6  ;;  %p220_p13 = por %p219_p12, %p218_p11 }
  0x24   :  { %159 = vpow2.f32 %v50_v7  ;;  %v105_v60 = vadd.f32 %v103_v54, %v101_v53 }
  0x25   :  { %p221_p0 = pnand %p220_p13, %p214_p10 }
  0x30   :  { %v158_v8 = vpop.eup %157 }
  0x31   :  { %v160_v9 = vpop.eup %159  ;;  %v58_v10 = vadd.f32 1.0, %v158_v8  ;;  %v61_v29 = vmul.f32 -0.5, %v158_v8  ;;  %v64_v36 = vand.u32 2147483647, %v158_v8 }
  0x32   :  { %v67_v11 = vadd.f32 1.0, %v160_v9  ;;  %v70_v31 = vmul.f32 -0.5, %v160_v9  ;;  %v73_v39 = vand.u32 2147483647, %v160_v9 }
  0x33   :  { %161 = vrcp.f32 %v58_v10  ;;  %v62_v34 = vadd.f32 1.0, %v61_v29  ;;  %vm65_vm2 = vcmp.lt.f32.partialorder %v64_v36, 0.0004427343 }
  0x34   :  { %163 = vrcp.f32 %v67_v11  ;;  %v71_v37 = vadd.f32 1.0, %v70_v31  ;;  %vm74_vm3 = vcmp.lt.f32.partialorder %v73_v39, 0.0004427343 }
  0x35   :  { %165 = vlog2.f32 %v58_v10  ;;  %v63_v45 = vmul.f32 %v158_v8, %v62_v34 }
  0x36   :  { %167 = vlog2.f32 %v67_v11  ;;  %v72_v47 = vmul.f32 %v160_v9, %v71_v37 }
  0x40   :  { %v162_v13 = vpop.eup %161 }
  0x41   :  { %v164_v15 = vpop.eup %163  ;;  %v86_v16 = vmul.f32 %v162_v13, %v158_v8 }
  0x42   :  { %v87_v17 = vmul.f32 %v164_v15, %v160_v9  ;;  %v166_v35 = vpop.eup %165 }
  0x43   :  { %v88_v19 = vsel %vm84_vm0, %v162_v13, %v86_v16  ;;  %v168_v38 = vpop.eup %167  ;;  %v60_v44 = vmul.f32 0.6931472, %v166_v35 }
  0x44   :  { %v89_v21 = vsel %vm85_vm1, %v164_v15, %v87_v17  ;;  %v90_v22 = vmul.f32 %v88_v19, %v42_v12  ;;  %v94_v23 = vsub.f32 1.0, %v88_v19  ;;  %v69_v46 = vmul.f32 0.6931472, %v168_v38 }
  0x45   :  { %v91_v24 = vmul.f32 %v89_v21, %v43_v14  ;;  %v95_v25 = vsub.f32 1.0, %v89_v21  ;;  %v66_v52 = vsel %vm65_vm2, %v63_v45, %v60_v44 }
  0x46   :  { %v96_v26 = vmul.f32 %v94_v23, %v92_v18  ;;  %v75_v55 = vsel %vm74_vm3, %v72_v47, %v69_v46  ;;  %v76_v56 = vadd.f32 %v66_v52, %v56_v48 }
  0x47   :  { %v97_v27 = vmul.f32 %v95_v25, %v93_v20  ;;  %v77_v59 = vadd.f32 %v75_v55, %v57_v51 }
  0x48   :  { %v98_v28 = vadd.f32 %v96_v26, %v90_v22  ;;  %v124_v3 = vmul.f32 %v104_v57, %v76_v56 }
  0x49   :  { %v99_v30 = vadd.f32 %v97_v27, %v91_v24  ;;  %v125_v6 = vmul.f32 %v105_v60, %v77_v59 }
  0x4a   :  { %v106_v32 = vsub.f32 1.0, %v98_v28 }
  0x4b   :  { %v107_v33 = vsub.f32 1.0, %v99_v30 }
  0x4c   :  { %169 = vrsqrt.f32 %v106_v32  ;;  %vm110_vm4 = vcmp.eq.f32.partialorder %v106_v32, inf  ;;  %v113_v61 = vand.u32 2147483648, %v106_v32  ;;  %vm112_vm5 = vcmp.eq.f32.partialorder %v106_v32, 0.0 }
  0x4d   :  { %171 = vrsqrt.f32 %v107_v33  ;;  %vm117_vm6 = vcmp.eq.f32.partialorder %v107_v33, inf  ;;  %v120_v0 = vand.u32 2147483648, %v107_v33  ;;  %vm119_vm7 = vcmp.eq.f32.partialorder %v107_v33, 0.0 }
  0x59   :  { %v170_v58 = vpop.eup %169 }
  0x5a   :  { %v172_v62 = vpop.eup %171  ;;  %v109_v63 = vmul.f32 %v170_v58, %v106_v32 }
  0x5b   :  { %v116_v1 = vmul.f32 %v172_v62, %v107_v33 }
  0x5c   :  { %v111_v2 = vsel %vm110_vm4, %v106_v32, %v109_v63 }
  0x5d   :  { %v114_v4 = vsel %vm112_vm5, %v113_v61, %v111_v2  ;;  %v118_v5 = vsel %vm117_vm6, %v107_v33, %v116_v1 }
  0x5e   :  { %v121_v7 = vsel %vm119_vm7, %v120_v0, %v118_v5  ;;  %v122_v8 = vmul.f32 %v114_v4, %v106_v32 }
  0x5f   :  { %v123_v9 = vmul.f32 %v121_v7, %v107_v33 }
  0x60   :  { %v126_v10 = vmul.f32 %v124_v3, %v122_v8 }
  0x61   :  { %v127_v11 = vmul.f32 %v125_v6, %v123_v9 }
  0x63   :  { %v128_v12 = vadd.f32 %v127_v11, %v126_v10 }
  0x65   :  { %v129_v13 = vrot.slane %v128_v12, 4 }
  0x67   :  { %v130_v14 = vadd.f32 %v129_v13, %v128_v12 }
  0x69   :  { %v131_v15 = vrot.slane %v130_v14, 2 }
  0x6b   :  { %v132_v16 = vadd.f32 %v131_v15, %v130_v14 }
  0x6d   :  { %v133_v17 = vrot.slane %v132_v16, 1 }
  0x6f   :  { %v134_v18 = vadd.f32 %v133_v17, %v132_v16 }
  0x71   :  { %135 = vst [vmem:[#allocation7] sm:$0x1] %v134_v18 }
  0x72   :  { %224 = shalt.err (!%p221_p0)
}
  0x73   :  { %145 = dma.vmem_to_hbm [thread:$0]  %s143_s1, 16, %s276_s2, [#allocation4]  }
  0x74   :  { %237 = dma.done.wait [#allocation4], 16  }
  0x75   :  { %238 = vsyncadd [#allocation4], 4294967280 }
  0x76   :  { %149 = vsyncpa [#allocation3], 1 }
  0x77   :  { %150 = vsyncpa [#allocation6], 1 }
  0x78   :  { %151 = vsyncpa [#allocation4], 1 }

</bundles_post_ra>
